<compile_context>
chip_gen: v6e
topology: v6e:2x2x1
jax: 0.10.0
libtpu: 0.0.40
codegen_flags: <defaults>
</compile_context>

<pallas_src>
import functools

import jax
import jax.numpy as jnp
from jax.experimental import pallas as pl
from jax.experimental.pallas import tpu as pltpu


def _round_up(a: int, m: int) -> int:
    return (a + m - 1) // m * m


def _cdiv(a: int, b: int) -> int:
    return -(-a // b)


def _vmem_capacity_bytes() -> int:
    """Generation-aware VMEM capacity (v5e/v6e: 128 MiB, v7x: 64 MiB/core)."""
    try:
        cap = getattr(pltpu.get_tpu_info(), "vmem_capacity_bytes", None)
        if cap:
            return int(cap)
    except Exception:
        pass
    return 64 * 1024 * 1024  # conservative fallback (v7x per-core)


# --------------------------------------------------------------------------- #
# Position-wise feed-forward sublayer kernels
# --------------------------------------------------------------------------- #
def _ffn_kernel_single(x_ref, w1_ref, b1_ref, w2_ref, b2_ref, o_ref):
    # Whole d_ff fits in one chunk: no accumulator round trip at all.
    h = jnp.dot(x_ref[...], w1_ref[...], preferred_element_type=jnp.float32)
    h = jnp.maximum(h + b1_ref[...], 0.0)  # ReLU (+bias)
    # TODO(synk): training-mode dropout not emitted (inference identity).
    out = jnp.dot(h.astype(w2_ref.dtype), w2_ref[...],
                  preferred_element_type=jnp.float32)
    o_ref[...] = (out + b2_ref[...]).astype(o_ref.dtype)


def _ffn_kernel_acc_out(x_ref, w1_ref, b1_ref, w2_ref, b2_ref, o_ref):
    # d_ff streamed in chunks; f32 output -> accumulate directly into the
    # VMEM-resident output block (its block index is constant across k).
    k = pl.program_id(1)
    h = jnp.dot(x_ref[...], w1_ref[...], preferred_element_type=jnp.float32)
    h = jnp.maximum(h + b1_ref[...], 0.0)
    part = jnp.dot(h.astype(w2_ref.dtype), w2_ref[...],
                   preferred_element_type=jnp.float32)

    @pl.when(k == 0)
    def _():
        o_ref[...] = part + b2_ref[...]

    @pl.when(k > 0)
    def _():
        o_ref[...] += part


def _ffn_kernel_acc_scratch(x_ref, w1_ref, b1_ref, w2_ref, b2_ref, o_ref,
                            acc_ref):
    # d_ff streamed in chunks, non-f32 output: f32 scratch accumulator with
    # first-chunk assignment (no separate zero-init pass).
    k = pl.program_id(1)
    h = jnp.dot(x_ref[...], w1_ref[...], preferred_element_type=jnp.float32)
    h = jnp.maximum(h + b1_ref[...], 0.0)
    part = jnp.dot(h.astype(w2_ref.dtype), w2_ref[...],
                   preferred_element_type=jnp.float32)

    @pl.when(k == 0)
    def _():
        acc_ref[...] = part

    @pl.when(k > 0)
    def _():
        acc_ref[...] += part

    @pl.when(k == pl.num_programs(1) - 1)
    def _():
        o_ref[...] = (acc_ref[...] + b2_ref[...]).astype(o_ref.dtype)


def positionwise_feed_forward(x, w1, b1, w2, b2, *,
                              tn_max=None,
                              compute_dtype=jnp.bfloat16,
                              vmem_budget_bytes=None):
    """x: (batch, seq, d_model); w1: (d_model, d_ff); w2: (d_ff, d_model)."""
    B, S, d_model = x.shape
    d_ff = w1.shape[1]
    N = B * S
    out_dtype = x.dtype
    cbytes = jnp.dtype(compute_dtype).itemsize
    obytes = jnp.dtype(out_dtype).itemsize

    cap = _vmem_capacity_bytes()
    if vmem_budget_bytes is None:
        # v7x-class (64 MiB/core): ~38 MiB; v5e/v6e (128 MiB): ~102 MiB.
        vmem_budget_bytes = (int(0.60 * cap) if cap <= (80 << 20)
                             else int(0.80 * cap))
    if tn_max is None:
        tn_max = 512 if cap >= (96 << 20) else 256

    # ---- lane/sublane-dense padded shapes -----------------------------------
    d_model_p = _round_up(d_model, 128)
    tn = _round_up(N, 8)
    if tn < 128:
        tn = 128                      # keep MXU M-dim reasonably occupied
    tn = min(tn, tn_max)
    N_p = _round_up(N, tn)

    # ---- choose d_ff chunking: chunk-count first so padding stays ~128 ------
    def vmem_estimate(tk):
        est = 0
        est += 2 * tn * d_model_p * cbytes          # x tile (double buffered)
        est += 2 * tn * d_model_p * obytes          # out tile
        est += 2 * d_model_p * tk * cbytes          # w1 chunk
        est += 2 * tk * d_model_p * cbytes          # w2 chunk
        est += 2 * 8 * tk * 4                       # b1 (sublane padded)
        est += 2 * 8 * d_model_p * 4                # b2
        est += tn * d_model_p * 4                   # f32 accumulator
        est += tn * tk * 4                          # relu intermediate
        return est

    d_ff_128 = _round_up(d_ff, 128)
    tk_fit = d_ff_128
    while tk_fit > 128 and vmem_estimate(tk_fit) > vmem_budget_bytes:
        tk_fit -= 128
    n_kff = _cdiv(d_ff_128, tk_fit)
    tk_ff = _round_up(_cdiv(d_ff_128, n_kff), 128)
    d_ff_pad = tk_ff * n_kff

    est = vmem_estimate(tk_ff)
    vmem_limit = max(32 << 20, int(1.25 * est))
    vmem_limit = int(min(vmem_limit, cap - (8 << 20)))   # headroom on v7x

    # ---- pad/cast operands only when actually needed ------------------------
    def pad2d(m, rp, cp, dtype):
        r, c = m.shape
        m = m.astype(dtype)
        if r == rp and c == cp:
            return m
        return jnp.zeros((rp, cp), dtype).at[:r, :c].set(m)

    def pad_bias(b, cp):
        b = b.astype(jnp.float32).reshape(1, -1)
        if b.shape[1] == cp:
            return b
        return jnp.zeros((1, cp), jnp.float32).at[:, :b.shape[1]].set(b)

    x_p = pad2d(x.reshape(N, d_model), N_p, d_model_p, compute_dtype)
    w1_p = pad2d(w1, d_model_p, d_ff_pad, compute_dtype)
    w2_p = pad2d(w2, d_ff_pad, d_model_p, compute_dtype)
    b1_p = pad_bias(b1, d_ff_pad)
    b2_p = pad_bias(b2, d_model_p)

    grid = (N_p // tn, n_kff)
    n_row_tiles = grid[0]

    # Weights are re-streamed once per row tile when d_ff is chunked.
    w_bytes = (w1_p.size + w2_p.size) * cbytes
    w_reread = n_row_tiles if n_kff > 1 else 1
    cost = pl.CostEstimate(
        flops=4 * N_p * d_model_p * d_ff_pad,
        transcendentals=0,
        bytes_accessed=int(x_p.size * cbytes + w_bytes * w_reread
                           + N_p * d_model_p * obytes))

    if n_kff == 1:
        kernel = _ffn_kernel_single
        scratch = []
    elif jnp.dtype(out_dtype) == jnp.dtype(jnp.float32):
        kernel = _ffn_kernel_acc_out
        scratch = []
    else:
        kernel = _ffn_kernel_acc_scratch
        scratch = [pltpu.VMEM((tn, d_model_p), jnp.float32)]

    out2d = pl.pallas_call(
        kernel,
        out_shape=jax.ShapeDtypeStruct((N_p, d_model_p), out_dtype),
        grid_spec=pltpu.PrefetchScalarGridSpec(
            num_scalar_prefetch=0,
            grid=grid,
            in_specs=[
                pl.BlockSpec((tn, d_model_p), lambda i, k: (i, 0)),     # x
                pl.BlockSpec((d_model_p, tk_ff), lambda i, k: (0, k)),  # w1
                pl.BlockSpec((1, tk_ff), lambda i, k: (0, k)),          # b1
                pl.BlockSpec((tk_ff, d_model_p), lambda i, k: (k, 0)),  # w2
                pl.BlockSpec((1, d_model_p), lambda i, k: (0, 0)),      # b2
            ],
            out_specs=pl.BlockSpec((tn, d_model_p), lambda i, k: (i, 0)),
            scratch_shapes=scratch,
        ),
        compiler_params=pltpu.CompilerParams(
            dimension_semantics=("parallel", "arbitrary"),
            vmem_limit_bytes=vmem_limit),
        cost_estimate=cost,
    )(x_p, w1_p, b1_p, w2_p, b2_p)

    if N_p != N or d_model_p != d_model:
        out2d = out2d[:N, :d_model]
    return out2d.reshape(B, S, d_model)


# --------------------------------------------------------------------------- #
# Decoder final LayerNorm (torch semantics: unbiased std, eps added to std)
# --------------------------------------------------------------------------- #
def _layernorm_kernel(x_ref, a_ref, b_ref, o_ref, *, d, eps):
    x = x_ref[...].astype(jnp.float32)                         # (tn, d)
    mean = jnp.mean(x, axis=-1, keepdims=True)
    xc = x - mean
    var = jnp.sum(xc * xc, axis=-1, keepdims=True) / max(d - 1, 1)  # unbiased
    std = jnp.sqrt(var)
    y = a_ref[...] * (xc / (std + eps)) + b_ref[...]
    o_ref[...] = y.astype(o_ref.dtype)


def layer_norm(x, a_2, b_2, *, eps=1e-6, tn_max=512):
    """Decoder.norm(x): a_2 * (x - mean) / (std + eps) + b_2 (last axis)."""
    B, S, d = x.shape
    N = B * S
    tn = min(tn_max, _round_up(N, 8))
    N_p = _round_up(N, tn)

    x2d = x.reshape(N, d)
    if N_p != N:
        x2d = jnp.zeros((N_p, d), x.dtype).at[:N].set(x2d)
    a2d = a_2.astype(jnp.float32).reshape(1, d)
    b2d = b_2.astype(jnp.float32).reshape(1, d)

    out2d = pl.pallas_call(
        functools.partial(_layernorm_kernel, d=d, eps=eps),
        out_shape=jax.ShapeDtypeStruct((N_p, d), x.dtype),
        grid_spec=pltpu.PrefetchScalarGridSpec(
            num_scalar_prefetch=0,
            grid=(N_p // tn,),
            in_specs=[pl.BlockSpec((tn, d), lambda i: (i, 0)),
                      pl.BlockSpec((1, d), lambda i: (0, 0)),
                      pl.BlockSpec((1, d), lambda i: (0, 0))],
            out_specs=pl.BlockSpec((tn, d), lambda i: (i, 0)),
        ),
        compiler_params=pltpu.CompilerParams(
            dimension_semantics=("parallel",)),
    )(x2d, a2d, b2d)

    if N_p != N:
        out2d = out2d[:N]
    return out2d.reshape(B, S, d)


# --------------------------------------------------------------------------- #
# Pure-JAX references
# --------------------------------------------------------------------------- #
def _ref_ffn(x, w1, b1, w2, b2):
    return jnp.maximum(x @ w1 + b1, 0.0) @ w2 + b2


def _ref_layernorm(x, a_2, b_2, eps=1e-6):
    mean = x.mean(-1, keepdims=True)
    std = jnp.std(x, axis=-1, keepdims=True, ddof=1)
    return a_2 * (x - mean) / (std + eps) + b_2


if __name__ == "__main__":
    key = jax.random.PRNGKey(0)
    batch, seq, d_model, d_ff = 2, 8, 32, 64
    kx, k1, kb1, k2, kb2, ka, kb, k3 = jax.random.split(key, 8)
    x = jax.random.normal(kx, (batch, seq, d_model), dtype=jnp.float32)
    bound1 = 1.0 / (d_model ** 0.5)
    bound2 = 1.0 / (d_ff ** 0.5)
    w1 = jax.random.uniform(k1, (d_model, d_ff), jnp.float32, -bound1, bound1)
    b1 = jax.random.uniform(kb1, (d_ff,), jnp.float32, -bound1, bound1)
    w2 = jax.random.uniform(k2, (d_ff, d_model), jnp.float32, -bound2, bound2)
    b2 = jax.random.uniform(kb2, (d_model,), jnp.float32, -bound2, bound2)

    # 1) FFN, bf16 compute: resident weights, single d_ff chunk (no scratch).
    out_bf16 = jax.block_until_ready(
        positionwise_feed_forward(x, w1, b1, w2, b2,
                                  compute_dtype=jnp.bfloat16))
    ref = _ref_ffn(x, w1, b1, w2, b2)
    assert out_bf16.shape == (batch, seq, d_model)
    assert jnp.allclose(out_bf16, ref, atol=3e-2, rtol=3e-2)

    # 1b) FFN, f32 compute, tight tolerance.
    out_f32 = jax.block_until_ready(
        positionwise_feed_forward(x, w1, b1, w2, b2,
                                  compute_dtype=jnp.float32))
    assert jnp.allclose(out_f32, ref, atol=1e-4, rtol=1e-4)

    # 2) Larger d_ff + tiny VMEM budget -> streamed d_ff chunks; f32 output is
    #    accumulated directly into the VMEM-resident output block.
    d_ff2 = 512
    k4, k5, k6, k7 = jax.random.split(k3, 4)
    bound3 = 1.0 / (d_ff2 ** 0.5)
    w1b = jax.random.uniform(k4, (d_model, d_ff2), jnp.float32, -bound1, bound1)
    b1b = jax.random.uniform(k5, (d_ff2,), jnp.float32, -bound1, bound1)
    w2b = jax.random.uniform(k6, (d_ff2, d_model), jnp.float32, -bound3, bound3)
    b2b = jax.random.uniform(k7, (d_model,), jnp.float32, -bound3, bound3)
    out2 = jax.block_until_ready(
        positionwise_feed_forward(x, w1b, b1b, w2b, b2b,
                                  compute_dtype=jnp.float32,
                                  vmem_budget_bytes=300 * 1024))
    ref2 = _ref_ffn(x, w1b, b1b, w2b, b2b)
    assert jnp.allclose(out2, ref2, atol=1e-4, rtol=1e-4)

    # 3) Streamed chunks with bf16 output -> f32 scratch-accumulator path.
    x_bf16 = x.astype(jnp.bfloat16)
    out3 = jax.block_until_ready(
        positionwise_feed_forward(x_bf16, w1b, b1b, w2b, b2b,
                                  compute_dtype=jnp.bfloat16,
                                  vmem_budget_bytes=256 * 1024))
    ref3 = _ref_ffn(x_bf16.astype(jnp.float32),
                    w1b.astype(jnp.bfloat16).astype(jnp.float32), b1b,
                    w2b.astype(jnp.bfloat16).astype(jnp.float32), b2b)
    assert jnp.allclose(out3.astype(jnp.float32), ref3, atol=3e-2, rtol=3e-2)

    # 4) Decoder final LayerNorm (Decoder.norm) against torch-semantics ref.
    a_2 = 1.0 + 0.1 * jax.random.normal(ka, (d_model,), dtype=jnp.float32)
    b_2 = 0.1 * jax.random.normal(kb, (d_model,), dtype=jnp.float32)
    out_ln = jax.block_until_ready(layer_norm(out_f32, a_2, b_2))
    ref_ln = _ref_layernorm(out_f32, a_2, b_2)
    assert jnp.allclose(out_ln, ref_ln, atol=1e-4, rtol=1e-4)

    print("KERNEL_OK")
</pallas_src>

<mosaic_0001>
module attributes {stable_mosaic.version = 11 : i64} {
  func.func @_ffn_kernel_single(%arg0: i32, %arg1: i32, %arg2: memref<128x128xbf16, #tpu.memory_space<vmem>>, %arg3: memref<128x128xbf16, #tpu.memory_space<vmem>>, %arg4: memref<1x128xf32, #tpu.memory_space<vmem>>, %arg5: memref<128x128xbf16, #tpu.memory_space<vmem>>, %arg6: memref<1x128xf32, #tpu.memory_space<vmem>>, %arg7: memref<128x128xf32, #tpu.memory_space<vmem>>) attributes {dimension_semantics = [#tpu.dimension_semantics<parallel>, #tpu.dimension_semantics<arbitrary>], iteration_bounds = array<i64: 1, 1>, scalar_prefetch = 0 : i64, scratch_operands = 0 : i64, tpu.core_type = #tpu.core_type<tc>, window_params = [{transform_indices = @transform_0, window_bounds = array<i64: 128, 128>}, {transform_indices = @transform_1, window_bounds = array<i64: 128, 128>}, {transform_indices = @transform_2, window_bounds = array<i64: 1, 128>}, {transform_indices = @transform_3, window_bounds = array<i64: 128, 128>}, {pipeline_mode = #tpu.pipeline_mode<synchronous>, transform_indices = @transform_4, window_bounds = array<i64: 1, 128>}, {transform_indices = @transform_5, window_bounds = array<i64: 128, 128>}]} {
    %c0 = arith.constant 0 : index
    %c0_0 = arith.constant 0 : index
    %0 = vector.load %arg2[%c0, %c0_0] : memref<128x128xbf16, #tpu.memory_space<vmem>>, vector<128x128xbf16>
    %c0_1 = arith.constant 0 : index
    %c0_2 = arith.constant 0 : index
    %1 = vector.load %arg3[%c0_1, %c0_2] : memref<128x128xbf16, #tpu.memory_space<vmem>>, vector<128x128xbf16>
    %cst = arith.constant dense<0.000000e+00> : vector<128x128xf32>
    %2 = tpu.matmul %0, %1, %cst {dimension_numbers = #tpu.dot_dimension_numbers<[1], [0], [0], [1], [0, 0, 1, 1], [], []>} : vector<128x128xbf16>, vector<128x128xbf16>, vector<128x128xf32> -> vector<128x128xf32>
    %c0_3 = arith.constant 0 : index
    %c0_4 = arith.constant 0 : index
    %3 = vector.load %arg4[%c0_3, %c0_4] : memref<1x128xf32, #tpu.memory_space<vmem>>, vector<1x128xf32>
    %4 = vector.broadcast %3 : vector<1x128xf32> to vector<128x128xf32>
    %5 = arith.addf %2, %4 : vector<128x128xf32>
    %cst_5 = arith.constant 0.000000e+00 : f32
    %6 = vector.broadcast %cst_5 : f32 to vector<128x128xf32>
    %7 = arith.maximumf %5, %6 : vector<128x128xf32>
    %8 = arith.truncf %7 : vector<128x128xf32> to vector<128x128xbf16>
    %c0_6 = arith.constant 0 : index
    %c0_7 = arith.constant 0 : index
    %9 = vector.load %arg5[%c0_6, %c0_7] : memref<128x128xbf16, #tpu.memory_space<vmem>>, vector<128x128xbf16>
    %cst_8 = arith.constant dense<0.000000e+00> : vector<128x128xf32>
    %10 = tpu.matmul %8, %9, %cst_8 {dimension_numbers = #tpu.dot_dimension_numbers<[1], [0], [0], [1], [0, 0, 1, 1], [], []>} : vector<128x128xbf16>, vector<128x128xbf16>, vector<128x128xf32> -> vector<128x128xf32>
    %c0_9 = arith.constant 0 : index
    %c0_10 = arith.constant 0 : index
    %11 = vector.load %arg6[%c0_9, %c0_10] : memref<1x128xf32, #tpu.memory_space<vmem>>, vector<1x128xf32>
    %12 = vector.broadcast %11 : vector<1x128xf32> to vector<128x128xf32>
    %13 = arith.addf %10, %12 : vector<128x128xf32>
    %c0_11 = arith.constant 0 : index
    %c0_12 = arith.constant 0 : index
    %14 = vector.load %arg7[%c0_11, %c0_12] : memref<128x128xf32, #tpu.memory_space<vmem>>, vector<128x128xf32>
    tpu.vector_store %arg7[%c0_11, %c0_12], %13 {strides = array<i32>} : memref<128x128xf32, #tpu.memory_space<vmem>>, vector<128x128xf32>,
    return
  }
  func.func @transform_0(%arg0: i32, %arg1: i32) -> (i32, i32) {
    %c0_i32 = arith.constant 0 : i32
    %c0_i32_0 = arith.constant 0 : i32
    return %arg0, %c0_i32 : i32, i32
  }
  func.func @transform_1(%arg0: i32, %arg1: i32) -> (i32, i32) {
    %c0_i32 = arith.constant 0 : i32
    %c0_i32_0 = arith.constant 0 : i32
    return %c0_i32, %arg1 : i32, i32
  }
  func.func @transform_2(%arg0: i32, %arg1: i32) -> (i32, i32) {
    %c0_i32 = arith.constant 0 : i32
    %c0_i32_0 = arith.constant 0 : i32
    return %c0_i32, %arg1 : i32, i32
  }
  func.func @transform_3(%arg0: i32, %arg1: i32) -> (i32, i32) {
    %c0_i32 = arith.constant 0 : i32
    %c0_i32_0 = arith.constant 0 : i32
    return %arg1, %c0_i32 : i32, i32
  }
  func.func @transform_4(%arg0: i32, %arg1: i32) -> (i32, i32) {
    %c0_i32 = arith.constant 0 : i32
    %c0_i32_0 = arith.constant 0 : i32
    %c0_i32_1 = arith.constant 0 : i32
    return %c0_i32, %c0_i32_0 : i32, i32
  }
  func.func @transform_5(%arg0: i32, %arg1: i32) -> (i32, i32) {
    %c0_i32 = arith.constant 0 : i32
    %c0_i32_0 = arith.constant 0 : i32
    return %arg0, %c0_i32 : i32, i32
  }
}

</mosaic_0001>

<bundles_post_ra>
// kernel: tpu_custom_call.1
= control target key start
LH: loop header
LB: loop body
LE: loop exit
PB: predicated region body
PF: predicated region fallthrough
CT: control target
= control target key end

     0   :  { %10 = vsyncpa [#allocation3], 0  ;;  %s817_s0 = inlined_call_operand.hbm [shape: bf16[128,128], index: 0, kind: input, shape index: {}]   ;;  %s818_s1 = inlined_call_operand.hbm [shape: bf16[128,128], index: 1, kind: input, shape index: {}]   ;;  %s819_s2 = inlined_call_operand.vmem [shape: f32[1,128], index: 2, kind: input, shape index: {}]   ;;  %s820_s3 = inlined_call_operand.hbm [shape: bf16[128,128], index: 3, kind: input, shape index: {}]   ;;  %s821_s4 = inlined_call_operand.vmem [shape: f32[1,128], index: 4, kind: input, shape index: {}]   ;;  %s822_s5 = inlined_call_operand.hbm [shape: f32[128,128], index: 5, kind: output, shape index: {}]  }
   0x1   :  { %11 = vsyncpa [#allocation6], 0 }
   0x2   :  { %12 = vsyncpa [#allocation4], 0  ;;  %s761_s18 = smov [#allocation5]   ;;  %s762_s20 = smov [#allocation2]  }
   0x3   :  { %s30_s19 = sshll.u32 %s761_s18, 4  ;;  %s18_s21 = sshll.u32 %s762_s20, 4  ;;  %s31_s19 = int_to_ptr.vmem [resolvable:$true] %s30_s19  ;;  %s19_s21 = int_to_ptr.vmem [resolvable:$true] %s18_s21 }
   0x4   :  { %s683_s22 = scalar_lea.vmem %s31_s19, 1024  ;;  %p688_p1 = scmp.lt.s32.totalorder %s31_s19, %s31_s19 }
   0x5   :  { %p684_p0 = scmp.ne.s32.totalorder %s31_s19, %s683_s22  ;;  %p689_p2 = scmp.lt.s32.totalorder %s683_s22, %s683_s22 }
   0x7   :  { %p690_p3 = por %p689_p2, %p688_p1 }
   0x9   :  { %p691_p4 = pnand %p690_p3, %p684_p0 }
   0xb   :  { %694 = shalt.err (!%p691_p4)
}
   0xc   :  { %s763_s23 = smov 64   ;;  %s764_s24 = smov 4  }
   0xd   :  { %36 = dma.hbm_to_vmem [thread:$0]  %s818_s1, 1024, %s31_s19, [#allocation6], %s763_s23, %s763_s23, %s764_s24  }
   0xe   :  { %s703_s27 = scalar_lea.vmem %s19_s21, 1024  ;;  %p708_p6 = scmp.lt.s32.totalorder %s19_s21, %s19_s21 }
   0xf   :  { %p704_p5 = scmp.ne.s32.totalorder %s19_s21, %s703_s27  ;;  %p709_p7 = scmp.lt.s32.totalorder %s703_s27, %s703_s27 }
  0x11   :  { %p710_p8 = por %p709_p7, %p708_p6 }
  0x13   :  { %p711_p9 = pnand %p710_p8, %p704_p5 }
  0x15   :  { %714 = shalt.err (!%p711_p9)
}
  0x16   :  { %24 = dma.hbm_to_vmem [thread:$0]  %s817_s0, 1024, %s19_s21, [#allocation3], %s763_s23, %s763_s23, %s764_s24  }
  0x17   :  { %s765_s30 = smov [#allocation7]  }
  0x18   :  { %s44_s6 = sshll.u32 %s765_s30, 4  ;;  %s45_s6 = int_to_ptr.vmem [resolvable:$true] %s44_s6 }
  0x19   :  { %s723_s7 = scalar_lea.vmem %s45_s6, 1024  ;;  %p728_p11 = scmp.lt.s32.totalorder %s45_s6, %s45_s6 }
  0x1a   :  { %p724_p10 = scmp.ne.s32.totalorder %s45_s6, %s723_s7  ;;  %p729_p12 = scmp.lt.s32.totalorder %s723_s7, %s723_s7 }
  0x1c   :  { %p730_p13 = por %p729_p12, %p728_p11 }
  0x1e   :  { %p731_p0 = pnand %p730_p13, %p724_p10 }
  0x20   :  { %734 = shalt.err (!%p731_p0)
}
  0x21   :  { %50 = dma.hbm_to_vmem [thread:$0]  %s820_s3, 1024, %s45_s6, [#allocation6], %s763_s23, %s763_s23, %s764_s24  }
  0x22   :  { %755 = dma.done.wait [#allocation3], 1024  }
  0x23   :  { %756 = vsyncadd [#allocation3], 4294966272 }
  0x24   :  { %757 = dma.done.wait [#allocation6], 2048  }
  0x25   :  { %758 = vsyncadd [#allocation6], 4294965248  ;;  %v651_v0 = vld [vmem:[#allocation5 + $0x38] sm:$0xff]   ;;  %v652_v1 = vld [vmem:[#allocation5 + $0x30] sm:$0xff]  }
  0x26   :  { %579 = vmatprep.subr.bf16.mxu0 %v651_v0  ;;  %v653_v2 = vld [vmem:[#allocation5 + $0x28] sm:$0xff]   ;;  %v654_v3 = vld [vmem:[#allocation5 + $0x20] sm:$0xff]   ;;  %v655_v5 = vld [vmem:[#allocation5 + $0x18] sm:$0xff]  }
  0x27   :  { %580 = vmatpush3.bf16.msra.mxu0 %v651_v0  ;;  %v659_v4 = vld [vmem:[#allocation2] sm:$0xff]   ;;  %v656_v6 = vld [vmem:[#allocation5 + $0x10] sm:$0xff]   ;;  %v667_v7 = vld [vmem:[#allocation7 + $0x38] sm:$0xff]  }
  0x28   :  { %581 = vmatprep.subr.bf16.mxu0 %v652_v1  ;;  %595 = vmatprep.mubr.bf16.mxu0 %v659_v4  ;;  %v668_v8 = vld [vmem:[#allocation7 + $0x30] sm:$0xff]   ;;  %v657_v9 = vld [vmem:[#allocation5 + $0x8] sm:$0xff]   ;;  %v658_v11 = vld [vmem:[#allocation5] sm:$0xff]  }
  0x29   :  { %611 = vmatprep.subr.bf16.mxu1 %v667_v7  ;;  %v669_v10 = vld [vmem:[#allocation7 + $0x28] sm:$0xff]   ;;  %v670_v12 = vld [vmem:[#allocation7 + $0x20] sm:$0xff]   ;;  %v671_v13 = vld [vmem:[#allocation7 + $0x18] sm:$0xff]  }
  0x2a   :  { %612 = vmatpush3.bf16.msra.mxu1 %v667_v7  ;;  %v660_v14 = vld [vmem:[#allocation2 + $0x8] sm:$0xff]   ;;  %v661_v15 = vld [vmem:[#allocation2 + $0x10] sm:$0xff]   ;;  %v662_v16 = vld [vmem:[#allocation2 + $0x18] sm:$0xff]  }
  0x2b   :  { %582 = vmatpush3.bf16.msra.mxu0 %v652_v1  ;;  %613 = vmatprep.subr.bf16.mxu1 %v668_v8  ;;  %v663_v17 = vld [vmem:[#allocation2 + $0x20] sm:$0xff]   ;;  %v664_v18 = vld [vmem:[#allocation2 + $0x28] sm:$0xff]   ;;  %v665_v19 = vld [vmem:[#allocation2 + $0x30] sm:$0xff]  }
  0x2c   :  { %583 = vmatprep.subr.bf16.mxu0 %v653_v2  ;;  %v666_v20 = vld [vmem:[#allocation2 + $0x38] sm:$0xff]   ;;  %v672_v21 = vld [vmem:[#allocation7 + $0x10] sm:$0xff]   ;;  %v673_v22 = vld [vmem:[#allocation7 + $0x8] sm:$0xff]  }
  0x2d   :  { %v674_v23 = vld [vmem:[#allocation7] sm:$0xff]  }
  0x2e   :  { %614 = vmatpush3.bf16.msra.mxu1 %v668_v8  ;;  %v521_v26 = vld [vmem:[%s819_s2] ss:$0 sm:$0xff] }
  0x2f   :  { %584 = vmatpush3.bf16.msra.mxu0 %v653_v2  ;;  %615 = vmatprep.subr.bf16.mxu1 %v669_v10 }
  0x30   :  { %585 = vmatprep.subr.bf16.mxu0 %v654_v3 }
  0x32   :  { %616 = vmatpush3.bf16.msra.mxu1 %v669_v10 }
  0x33   :  { %586 = vmatpush3.bf16.msra.mxu0 %v654_v3  ;;  %617 = vmatprep.subr.bf16.mxu1 %v670_v12 }
  0x34   :  { %587 = vmatprep.subr.bf16.mxu0 %v655_v5 }
  0x36   :  { %618 = vmatpush3.bf16.msra.mxu1 %v670_v12 }
  0x37   :  { %588 = vmatpush3.bf16.msra.mxu0 %v655_v5  ;;  %619 = vmatprep.subr.bf16.mxu1 %v671_v13 }
  0x38   :  { %589 = vmatprep.subr.bf16.mxu0 %v656_v6 }
  0x3a   :  { %620 = vmatpush3.bf16.msra.mxu1 %v671_v13 }
  0x3b   :  { %590 = vmatpush3.bf16.msra.mxu0 %v656_v6  ;;  %621 = vmatprep.subr.bf16.mxu1 %v672_v21 }
  0x3c   :  { %591 = vmatprep.subr.bf16.mxu0 %v657_v9 }
  0x3e   :  { %622 = vmatpush3.bf16.msra.mxu1 %v672_v21 }
  0x3f   :  { %592 = vmatpush3.bf16.msra.mxu0 %v657_v9  ;;  %623 = vmatprep.subr.bf16.mxu1 %v673_v22 }
  0x40   :  { %593 = vmatprep.subr.bf16.mxu0 %v658_v11 }
  0x42   :  { %624 = vmatpush3.bf16.msra.mxu1 %v673_v22 }
  0x43   :  { %594 = vmatpush3.bf16.msra.mxu0 %v658_v11  ;;  %625 = vmatprep.subr.bf16.mxu1 %v674_v23 }
  0x46   :  { %596 = vmatmul.mubr.bf16.vlgmr.msra.gmra.mxu0 %v660_v14  ;;  %626 = vmatpush3.bf16.msra.mxu1 %v674_v23 }
  0x47   :  { %599 = vmatprep.mubr.bf16.mxu0 %v661_v15 }
  0x4e   :  { %600 = vmatmul.mubr.bf16.gmra.mxu0 %v662_v16 }
  0x4f   :  { %603 = vmatprep.mubr.bf16.mxu0 %v663_v17  ;;  %v538_v17 = vld [vmem:[%s821_s4] ss:$0 sm:$0xff]  ;;  %s766_s4 = smov [#allocation8]  }
  0x50   :  { %s508_s10 = sshll.u32 %s766_s4, 4  ;;  %s509_s10 = int_to_ptr.vmem [resolvable:$true] %s508_s10 }
  0x51   :  { %s735_s11 = scalar_lea.vmem %s509_s10, 2048  ;;  %p740_p2 = scmp.lt.s32.totalorder %s509_s10, %s509_s10 }
  0x52   :  { %p736_p1 = scmp.ne.s32.totalorder %s509_s10, %s735_s11  ;;  %p741_p3 = scmp.lt.s32.totalorder %s735_s11, %s735_s11 }
  0x54   :  { %p742_p4 = por %p741_p3, %p740_p2 }
  0x56   :  { %604 = vmatmul.mubr.bf16.gmra.mxu0 %v664_v18  ;;  %p743_p5 = pnand %p742_p4, %p736_p1 }
  0x57   :  { %607 = vmatprep.mubr.bf16.mxu0 %v665_v19 }
  0x5e   :  { %608 = vmatmul.mubr.bf16.gmra.mxu0 %v666_v20 }
 0x106   :  { %v597_v24 = vpop.f32.mrf.mxu0 }
 0x107   :  { %v241_v30 = vadd.f32 %v597_v24, %v521_v26 }
 0x108   :  { %v232_v25 = vpop.f32.mrf.mxu0 }
 0x109   :  { %v233_v28 = vadd.f32 %v521_v26, %v232_v25  ;;  %v297_v37 = vmax.f32 %v241_v30, 0.0 }
 0x10a   :  { %v598_v27 = vpop.f32.mrf.mxu0 }
 0x10b   :  { %v244_v29 = vadd.f32 %v598_v27, %v521_v26  ;;  %v295_v35 = vmax.f32 %v233_v28, 0.0 }
 0x10c   :  { %v235_v31 = vpop.f32.mrf.mxu0 }
 0x10d   :  { %v236_v32 = vadd.f32 %v521_v26, %v235_v31  ;;  %v298_v33 = vmax.f32 %v244_v29, 0.0 }
 0x10e   :  { %v601_v34 = vpop.f32.mrf.mxu0 }
 0x10f   :  { %v296_v36 = vmax.f32 %v236_v32, 0.0  ;;  %v312_v40 = vpack.c.bf16 %v298_v33, %v297_v37  ;;  %v257_v44 = vadd.f32 %v601_v34, %v521_v26 }
 0x110   :  { %v248_v38 = vpop.f32.mrf.mxu0 }
 0x111   :  { %v311_v39 = vpack.c.bf16 %v296_v36, %v295_v35  ;;  %v249_v42 = vadd.f32 %v521_v26, %v248_v38  ;;  %v301_v51 = vmax.f32 %v257_v44, 0.0 }
 0x112   :  { %v602_v41 = vpop.f32.mrf.mxu0 }
 0x113   :  { %v260_v43 = vadd.f32 %v602_v41, %v521_v26  ;;  %627 = vmatprep.mubr.bf16.mxu1 %v311_v39  ;;  %v299_v49 = vmax.f32 %v249_v42, 0.0 }
 0x114   :  { %v251_v45 = vpop.f32.mrf.mxu0  ;;  %628 = vmatmul.mubr.bf16.vlgmr.msra.gmra.mxu1 %v312_v40 }
 0x115   :  { %v252_v46 = vadd.f32 %v521_v26, %v251_v45  ;;  %v302_v47 = vmax.f32 %v260_v43, 0.0 }
 0x116   :  { %v605_v48 = vpop.f32.mrf.mxu0 }
 0x117   :  { %v300_v50 = vmax.f32 %v252_v46, 0.0  ;;  %v314_v54 = vpack.c.bf16 %v302_v47, %v301_v51  ;;  %v273_v58 = vadd.f32 %v605_v48, %v521_v26 }
 0x118   :  { %v264_v52 = vpop.f32.mrf.mxu0 }
 0x119   :  { %v313_v53 = vpack.c.bf16 %v300_v50, %v299_v49  ;;  %v265_v56 = vadd.f32 %v521_v26, %v264_v52  ;;  %v305_v1 = vmax.f32 %v273_v58, 0.0 }
 0x11a   :  { %v606_v55 = vpop.f32.mrf.mxu0 }
 0x11b   :  { %v276_v57 = vadd.f32 %v606_v55, %v521_v26  ;;  %631 = vmatprep.mubr.bf16.mxu1 %v313_v53  ;;  %v303_v63 = vmax.f32 %v265_v56, 0.0 }
 0x11c   :  { %v267_v59 = vpop.f32.mrf.mxu0  ;;  %632 = vmatmul.mubr.bf16.gmra.mxu1 %v314_v54 }
 0x11d   :  { %v268_v60 = vadd.f32 %v521_v26, %v267_v59  ;;  %v306_v61 = vmax.f32 %v276_v57, 0.0 }
 0x11e   :  { %v609_v62 = vpop.f32.mrf.mxu0 }
 0x11f   :  { %v304_v0 = vmax.f32 %v268_v60, 0.0  ;;  %v316_v4 = vpack.c.bf16 %v306_v61, %v305_v1  ;;  %v289_v8 = vadd.f32 %v609_v62, %v521_v26 }
 0x120   :  { %v280_v2 = vpop.f32.mrf.mxu0 }
 0x121   :  { %v315_v3 = vpack.c.bf16 %v304_v0, %v303_v63  ;;  %v281_v6 = vadd.f32 %v521_v26, %v280_v2  ;;  %v309_v14 = vmax.f32 %v289_v8, 0.0 }
 0x122   :  { %v610_v5 = vpop.f32.mrf.mxu0 }
 0x123   :  { %v292_v7 = vadd.f32 %v610_v5, %v521_v26  ;;  %635 = vmatprep.mubr.bf16.mxu1 %v315_v3  ;;  %v307_v12 = vmax.f32 %v281_v6, 0.0 }
 0x124   :  { %v283_v9 = vpop.f32.mrf.mxu0  ;;  %636 = vmatmul.mubr.bf16.gmra.mxu1 %v316_v4 }
 0x125   :  { %v284_v10 = vadd.f32 %v521_v26, %v283_v9  ;;  %v310_v11 = vmax.f32 %v292_v7, 0.0 }
 0x127   :  { %v308_v13 = vmax.f32 %v284_v10, 0.0  ;;  %v318_v16 = vpack.c.bf16 %v310_v11, %v309_v14 }
 0x129   :  { %v317_v15 = vpack.c.bf16 %v308_v13, %v307_v12 }
 0x12b   :  { %639 = vmatprep.mubr.bf16.mxu1 %v317_v15 }
 0x12c   :  { %640 = vmatmul.mubr.bf16.gmra.mxu1 %v318_v16 }
 0x1d4   :  { %v629_v18 = vpop.f32.mrf.mxu1 }
 0x1d5   :  { %v433_v19 = vadd.f32 %v629_v18, %v538_v17 }
 0x1d6   :  { %v424_v20 = vpop.f32.mrf.mxu1 }
 0x1d7   :  { %489 = vst [vmem:[#allocation8 + $0x10] sm:$0xff] %v433_v19  ;;  %v425_v21 = vadd.f32 %v538_v17, %v424_v20 }
 0x1d8   :  { %v630_v22 = vpop.f32.mrf.mxu1 }
 0x1d9   :  { %487 = vst [vmem:[#allocation8] sm:$0xff] %v425_v21  ;;  %v436_v23 = vadd.f32 %v630_v22, %v538_v17 }
 0x1da   :  { %v427_v24 = vpop.f32.mrf.mxu1 }
 0x1db   :  { %490 = vst [vmem:[#allocation8 + $0x18] sm:$0xff] %v436_v23  ;;  %v428_v25 = vadd.f32 %v538_v17, %v427_v24 }
 0x1dc   :  { %v633_v26 = vpop.f32.mrf.mxu1 }
 0x1dd   :  { %488 = vst [vmem:[#allocation8 + $0x8] sm:$0xff] %v428_v25  ;;  %v449_v27 = vadd.f32 %v633_v26, %v538_v17 }
 0x1de   :  { %v440_v28 = vpop.f32.mrf.mxu1 }
 0x1df   :  { %493 = vst [vmem:[#allocation8 + $0x30] sm:$0xff] %v449_v27  ;;  %v441_v29 = vadd.f32 %v538_v17, %v440_v28 }
 0x1e0   :  { %v634_v30 = vpop.f32.mrf.mxu1 }
 0x1e1   :  { %491 = vst [vmem:[#allocation8 + $0x20] sm:$0xff] %v441_v29  ;;  %v452_v31 = vadd.f32 %v634_v30, %v538_v17 }
 0x1e2   :  { %v443_v32 = vpop.f32.mrf.mxu1 }
 0x1e3   :  { %494 = vst [vmem:[#allocation8 + $0x38] sm:$0xff] %v452_v31  ;;  %v444_v33 = vadd.f32 %v538_v17, %v443_v32 }
 0x1e4   :  { %v637_v34 = vpop.f32.mrf.mxu1 }
 0x1e5   :  { %492 = vst [vmem:[#allocation8 + $0x28] sm:$0xff] %v444_v33  ;;  %v465_v35 = vadd.f32 %v637_v34, %v538_v17 }
 0x1e6   :  { %v456_v36 = vpop.f32.mrf.mxu1 }
 0x1e7   :  { %497 = vst [vmem:[#allocation8 + $0x50] sm:$0xff] %v465_v35  ;;  %v457_v37 = vadd.f32 %v538_v17, %v456_v36 }
 0x1e8   :  { %v638_v38 = vpop.f32.mrf.mxu1 }
 0x1e9   :  { %495 = vst [vmem:[#allocation8 + $0x40] sm:$0xff] %v457_v37  ;;  %v468_v39 = vadd.f32 %v638_v38, %v538_v17 }
 0x1ea   :  { %v459_v40 = vpop.f32.mrf.mxu1 }
 0x1eb   :  { %498 = vst [vmem:[#allocation8 + $0x58] sm:$0xff] %v468_v39  ;;  %v460_v41 = vadd.f32 %v538_v17, %v459_v40 }
 0x1ec   :  { %v641_v42 = vpop.f32.mrf.mxu1 }
 0x1ed   :  { %496 = vst [vmem:[#allocation8 + $0x48] sm:$0xff] %v460_v41  ;;  %v481_v43 = vadd.f32 %v641_v42, %v538_v17 }
 0x1ee   :  { %v472_v44 = vpop.f32.mrf.mxu1 }
 0x1ef   :  { %501 = vst [vmem:[#allocation8 + $0x70] sm:$0xff] %v481_v43  ;;  %v473_v45 = vadd.f32 %v538_v17, %v472_v44 }
 0x1f0   :  { %v642_v46 = vpop.f32.mrf.mxu1 }
 0x1f1   :  { %499 = vst [vmem:[#allocation8 + $0x60] sm:$0xff] %v473_v45  ;;  %v484_v47 = vadd.f32 %v642_v46, %v538_v17 }
 0x1f2   :  { %v475_v48 = vpop.f32.mrf.mxu1 }
 0x1f3   :  { %502 = vst [vmem:[#allocation8 + $0x78] sm:$0xff] %v484_v47  ;;  %v476_v49 = vadd.f32 %v538_v17, %v475_v48 }
 0x1f5   :  { %500 = vst [vmem:[#allocation8 + $0x68] sm:$0xff] %v476_v49 }
 0x1f6   :  { %746 = shalt.err (!%p743_p5)
}
 0x1f7   :  { %s767_s12 = smov 128   ;;  %s768_s13 = smov 8  }
 0x1f8   :  { %514 = dma.vmem_to_hbm [thread:$0]  %s509_s10, 2048, %s822_s5, [#allocation4], %s767_s12, %s767_s12, %s768_s13  }
 0x1f9   :  { %759 = dma.done.wait [#allocation4], 2048  }
 0x1fa   :  { %760 = vsyncadd [#allocation4], 4294965248 }
 0x1fb   :  { %518 = vsyncpa [#allocation3], 1 }
 0x1fc   :  { %519 = vsyncpa [#allocation6], 1 }
 0x1fd   :  { %520 = vsyncpa [#allocation4], 1 }

</bundles_post_ra>
